<compile_context>
chip_gen: v7x
topology: tpu7x:2x2x1
jax: 0.10.0
libtpu: 0.0.40
codegen_flags: <defaults>
</compile_context>

<pallas_src>
import functools

import jax
import jax.numpy as jnp
from jax.experimental import pallas as pl
from jax.experimental.pallas import tpu as pltpu


def _conv3x3_relu_kernel(x_ref, w_ref, b_ref, m_ref, o_ref, *, img_w):
    """One grid step = one batch image.

    x_ref: (1, Cin_p, (H+2)*W + 2)  zero-row-padded, flattened input slab (+1 guard
                                    element on each end of the flat axis)
    w_ref: (3, Cout, 3*Cin_p)       weights grouped by kw; rows ordered (kh, ci)
    b_ref: (Cout, 1)                bias
    m_ref: (2, H*W)                 float {0,1} masks: row0 = not-left-border,
                                    row1 = not-right-border (per output position)
    o_ref: (1, Cout, H*W)           lane-dense, channel-major output
    """
    thw = o_ref.shape[2]

    not_left = m_ref[0:1, :] > 0.5    # (1, thw) bool
    not_right = m_ref[1:2, :] > 0.5   # (1, thw) bool

    def kw_taps(kw):
        # For output flat position p, tap (kh, kw, ci) = slab[ci, p + kh*W + kw].
        parts = [
            x_ref[0, :, kh * img_w + kw: kh * img_w + kw + thw]   # (Cin_p, thw)
            for kh in range(3)
        ]
        return jnp.concatenate(parts, axis=0)                     # (3*Cin_p, thw)

    # Three accumulating MXU matmuls, one per kw shift (kw=1 needs no masking).
    acc = jnp.dot(w_ref[1], kw_taps(1), preferred_element_type=jnp.float32)
    acc = acc + jnp.dot(w_ref[0], jnp.where(not_left, kw_taps(0), 0.0),
                        preferred_element_type=jnp.float32)
    acc = acc + jnp.dot(w_ref[2], jnp.where(not_right, kw_taps(2), 0.0),
                        preferred_element_type=jnp.float32)

    acc = acc + b_ref[...]                 # (Cout, 1) lane-broadcast
    out = jnp.maximum(acc, 0.0)            # ReLU
    o_ref[...] = out.astype(o_ref.dtype)[None]


def densenet_conv_forward(x_nchw, weight, bias):
    """x_nchw: (B, Cin, H, W); weight: (Cout, Cin, 3, 3) PyTorch OIHW; bias: (Cout,)."""
    B, Cin, H, W = x_nchw.shape
    Cout = weight.shape[0]
    thw = H * W
    cin_p = ((Cin + 7) // 8) * 8            # pad channels to an aligned sublane tile
    flat_len = (H + 2) * W + 2              # zero halo rows + 1 guard element per end

    # ---- wrapper glue (layout only; a single pad per array, no halo duplication) ----
    xf = x_nchw.astype(jnp.float32)
    x_p = jnp.pad(xf, ((0, 0), (0, cin_p - Cin), (1, 1), (0, 0)))   # pad=1 in H as zero rows
    flat = x_p.reshape(B, cin_p, (H + 2) * W)
    flat = jnp.pad(flat, ((0, 0), (0, 0), (1, 1)))                  # guard element each side

    # Weights grouped by kw: w3[kw, co, kh*cin_p + ci] = weight[co, ci, kh, kw].
    w_p = jnp.pad(weight.astype(jnp.float32),
                  ((0, 0), (0, cin_p - Cin), (0, 0), (0, 0)))
    w3 = jnp.transpose(w_p, (3, 0, 2, 1)).reshape(3, Cout, 3 * cin_p)
    b2 = bias.astype(jnp.float32).reshape(Cout, 1)

    # Precomputed W-border masks (avoid per-step integer mod on the VPU).
    ox = jnp.arange(thw, dtype=jnp.int32) % W
    masks = jnp.stack(
        [(ox > 0).astype(jnp.float32), (ox < W - 1).astype(jnp.float32)], axis=0
    )  # (2, thw)

    out_flat = pl.pallas_call(
        functools.partial(_conv3x3_relu_kernel, img_w=W),
        out_shape=jax.ShapeDtypeStruct((B, Cout, thw), jnp.float32),
        grid_spec=pltpu.PrefetchScalarGridSpec(
            num_scalar_prefetch=0,
            grid=(B,),
            in_specs=[
                pl.BlockSpec((1, cin_p, flat_len), lambda b: (b, 0, 0)),
                pl.BlockSpec((3, Cout, 3 * cin_p), lambda b: (0, 0, 0)),
                pl.BlockSpec((Cout, 1), lambda b: (0, 0)),
                pl.BlockSpec((2, thw), lambda b: (0, 0)),
            ],
            out_specs=pl.BlockSpec((1, Cout, thw), lambda b: (b, 0, 0)),
        ),
        compiler_params=pltpu.CompilerParams(
            dimension_semantics=("parallel",),
        ),
    )(flat, w3, b2, masks)

    # Already channel-major: only a free row-major reshape back to NCHW.
    return out_flat.reshape(B, Cout, H, W).astype(x_nchw.dtype)


def reference_forward(x_nchw, weight, bias):
    """Pure-JAX reference (lax conv) matching the PyTorch module."""
    out = jax.lax.conv_general_dilated(
        x_nchw.astype(jnp.float32),
        weight.astype(jnp.float32),
        window_strides=(1, 1),
        padding=((1, 1), (1, 1)),
        dimension_numbers=("NCHW", "OIHW", "NCHW"),
    )
    out = out + bias.reshape(1, -1, 1, 1)
    return jnp.maximum(out, 0.0).astype(x_nchw.dtype)


if __name__ == "__main__":
    # DenseNetConv(in_channels=4, out_channels=8) at small shapes.
    B, Cin, H, W = 2, 4, 16, 16
    Cout = 8

    key = jax.random.PRNGKey(0)
    kx, kw, kb = jax.random.split(key, 3)

    x = jax.random.normal(kx, (B, Cin, H, W), dtype=jnp.float32)
    weight = jax.random.normal(kw, (Cout, Cin, 3, 3), dtype=jnp.float32) * 0.1
    bias = jax.random.normal(kb, (Cout,), dtype=jnp.float32) * 0.1

    out = jax.block_until_ready(densenet_conv_forward(x, weight, bias))
    ref = jax.block_until_ready(reference_forward(x, weight, bias))

    assert out.shape == (B, Cout, H, W), out.shape
    max_err = float(jnp.max(jnp.abs(out - ref)))
    assert jnp.allclose(out, ref, atol=1e-4, rtol=1e-4), max_err

    print("KERNEL_OK")
</pallas_src>

<mosaic_0001>
module attributes {stable_mosaic.version = 11 : i64} {
  func.func @_conv3x3_relu_kernel(%arg0: i32, %arg1: memref<1x8x290xf32, #tpu.memory_space<vmem>>, %arg2: memref<3x8x24xf32, #tpu.memory_space<vmem>>, %arg3: memref<8x1xf32, #tpu.memory_space<vmem>>, %arg4: memref<2x256xf32, #tpu.memory_space<vmem>>, %arg5: memref<1x8x256xf32, #tpu.memory_space<vmem>>) attributes {dimension_semantics = [#tpu.dimension_semantics<parallel>], iteration_bounds = array<i64: 2>, scalar_prefetch = 0 : i64, scratch_operands = 0 : i64, tpu.core_type = #tpu.core_type<tc>, window_params = [{transform_indices = @transform_0, window_bounds = array<i64: 1, 8, 290>}, {pipeline_mode = #tpu.pipeline_mode<synchronous>, transform_indices = @transform_1, window_bounds = array<i64: 3, 8, 24>}, {pipeline_mode = #tpu.pipeline_mode<synchronous>, transform_indices = @transform_2, window_bounds = array<i64: 8, 1>}, {pipeline_mode = #tpu.pipeline_mode<synchronous>, transform_indices = @transform_3, window_bounds = array<i64: 2, 256>}, {transform_indices = @transform_4, window_bounds = array<i64: 1, 8, 256>}]} {
    %c0 = arith.constant 0 : index
    %c0_0 = arith.constant 0 : index
    %0 = vector.load %arg4[%c0, %c0_0] : memref<2x256xf32, #tpu.memory_space<vmem>>, vector<1x256xf32>
    %cst = arith.constant 5.000000e-01 : f32
    %1 = vector.broadcast %cst : f32 to vector<1x256xf32>
    %2 = arith.cmpf ogt, %0, %1 : vector<1x256xf32>
    %c1 = arith.constant 1 : index
    %c0_1 = arith.constant 0 : index
    %3 = vector.load %arg4[%c1, %c0_1] : memref<2x256xf32, #tpu.memory_space<vmem>>, vector<1x256xf32>
    %cst_2 = arith.constant 5.000000e-01 : f32
    %4 = vector.broadcast %cst_2 : f32 to vector<1x256xf32>
    %5 = arith.cmpf ogt, %3, %4 : vector<1x256xf32>
    %c1_3 = arith.constant 1 : index
    %c0_4 = arith.constant 0 : index
    %c0_5 = arith.constant 0 : index
    %6 = vector.load %arg2[%c1_3, %c0_4, %c0_5] : memref<3x8x24xf32, #tpu.memory_space<vmem>>, vector<1x8x24xf32>
    %7 = vector.shape_cast %6 : vector<1x8x24xf32> to vector<8x24xf32>
    %c0_6 = arith.constant 0 : index
    %c0_7 = arith.constant 0 : index
    %c1_8 = arith.constant 1 : index
    %8 = vector.load %arg1[%c0_6, %c0_7, %c1_8] : memref<1x8x290xf32, #tpu.memory_space<vmem>>, vector<1x8x256xf32>
    %9 = vector.shape_cast %8 : vector<1x8x256xf32> to vector<8x256xf32>
    %c0_9 = arith.constant 0 : index
    %c0_10 = arith.constant 0 : index
    %c17 = arith.constant 17 : index
    %10 = vector.load %arg1[%c0_9, %c0_10, %c17] : memref<1x8x290xf32, #tpu.memory_space<vmem>>, vector<1x8x256xf32>
    %11 = vector.shape_cast %10 : vector<1x8x256xf32> to vector<8x256xf32>
    %c0_11 = arith.constant 0 : index
    %c0_12 = arith.constant 0 : index
    %c33 = arith.constant 33 : index
    %12 = vector.load %arg1[%c0_11, %c0_12, %c33] : memref<1x8x290xf32, #tpu.memory_space<vmem>>, vector<1x8x256xf32>
    %13 = vector.shape_cast %12 : vector<1x8x256xf32> to vector<8x256xf32>
    %14 = tpu.concatenate %9, %11, %13 in 0 : vector<8x256xf32>, vector<8x256xf32>, vector<8x256xf32> -> vector<24x256xf32>
    %cst_13 = arith.constant dense<0.000000e+00> : vector<8x256xf32>
    %15 = tpu.matmul %7, %14, %cst_13 {dimension_numbers = #tpu.dot_dimension_numbers<[1], [0], [0], [1], [0, 0, 1, 1], [], []>} : vector<8x24xf32>, vector<24x256xf32>, vector<8x256xf32> -> vector<8x256xf32>
    %c0_14 = arith.constant 0 : index
    %c0_15 = arith.constant 0 : index
    %c0_16 = arith.constant 0 : index
    %16 = vector.load %arg2[%c0_14, %c0_15, %c0_16] : memref<3x8x24xf32, #tpu.memory_space<vmem>>, vector<1x8x24xf32>
    %17 = vector.shape_cast %16 : vector<1x8x24xf32> to vector<8x24xf32>
    %c0_17 = arith.constant 0 : index
    %c0_18 = arith.constant 0 : index
    %c0_19 = arith.constant 0 : index
    %18 = vector.load %arg1[%c0_17, %c0_18, %c0_19] : memref<1x8x290xf32, #tpu.memory_space<vmem>>, vector<1x8x256xf32>
    %19 = vector.shape_cast %18 : vector<1x8x256xf32> to vector<8x256xf32>
    %c0_20 = arith.constant 0 : index
    %c0_21 = arith.constant 0 : index
    %c16 = arith.constant 16 : index
    %20 = vector.load %arg1[%c0_20, %c0_21, %c16] : memref<1x8x290xf32, #tpu.memory_space<vmem>>, vector<1x8x256xf32>
    %21 = vector.shape_cast %20 : vector<1x8x256xf32> to vector<8x256xf32>
    %c0_22 = arith.constant 0 : index
    %c0_23 = arith.constant 0 : index
    %c32 = arith.constant 32 : index
    %22 = vector.load %arg1[%c0_22, %c0_23, %c32] : memref<1x8x290xf32, #tpu.memory_space<vmem>>, vector<1x8x256xf32>
    %23 = vector.shape_cast %22 : vector<1x8x256xf32> to vector<8x256xf32>
    %24 = tpu.concatenate %19, %21, %23 in 0 : vector<8x256xf32>, vector<8x256xf32>, vector<8x256xf32> -> vector<24x256xf32>
    %cst_24 = arith.constant 0.000000e+00 : f32
    %25 = vector.shape_cast %2 : vector<1x256xi1> to vector<1x256xi1>
    %26 = vector.broadcast %25 : vector<1x256xi1> to vector<24x256xi1>
    %27 = vector.broadcast %cst_24 : f32 to vector<24x256xf32>
    %28 = arith.select %26, %24, %27 : vector<24x256xi1>, vector<24x256xf32>
    %cst_25 = arith.constant dense<0.000000e+00> : vector<8x256xf32>
    %29 = tpu.matmul %17, %28, %cst_25 {dimension_numbers = #tpu.dot_dimension_numbers<[1], [0], [0], [1], [0, 0, 1, 1], [], []>} : vector<8x24xf32>, vector<24x256xf32>, vector<8x256xf32> -> vector<8x256xf32>
    %30 = arith.addf %15, %29 : vector<8x256xf32>
    %c2 = arith.constant 2 : index
    %c0_26 = arith.constant 0 : index
    %c0_27 = arith.constant 0 : index
    %31 = vector.load %arg2[%c2, %c0_26, %c0_27] : memref<3x8x24xf32, #tpu.memory_space<vmem>>, vector<1x8x24xf32>
    %32 = vector.shape_cast %31 : vector<1x8x24xf32> to vector<8x24xf32>
    %c0_28 = arith.constant 0 : index
    %c0_29 = arith.constant 0 : index
    %c2_30 = arith.constant 2 : index
    %33 = vector.load %arg1[%c0_28, %c0_29, %c2_30] : memref<1x8x290xf32, #tpu.memory_space<vmem>>, vector<1x8x256xf32>
    %34 = vector.shape_cast %33 : vector<1x8x256xf32> to vector<8x256xf32>
    %c0_31 = arith.constant 0 : index
    %c0_32 = arith.constant 0 : index
    %c18 = arith.constant 18 : index
    %35 = vector.load %arg1[%c0_31, %c0_32, %c18] : memref<1x8x290xf32, #tpu.memory_space<vmem>>, vector<1x8x256xf32>
    %36 = vector.shape_cast %35 : vector<1x8x256xf32> to vector<8x256xf32>
    %c0_33 = arith.constant 0 : index
    %c0_34 = arith.constant 0 : index
    %c34 = arith.constant 34 : index
    %37 = vector.load %arg1[%c0_33, %c0_34, %c34] : memref<1x8x290xf32, #tpu.memory_space<vmem>>, vector<1x8x256xf32>
    %38 = vector.shape_cast %37 : vector<1x8x256xf32> to vector<8x256xf32>
    %39 = tpu.concatenate %34, %36, %38 in 0 : vector<8x256xf32>, vector<8x256xf32>, vector<8x256xf32> -> vector<24x256xf32>
    %cst_35 = arith.constant 0.000000e+00 : f32
    %40 = vector.shape_cast %5 : vector<1x256xi1> to vector<1x256xi1>
    %41 = vector.broadcast %40 : vector<1x256xi1> to vector<24x256xi1>
    %42 = vector.broadcast %cst_35 : f32 to vector<24x256xf32>
    %43 = arith.select %41, %39, %42 : vector<24x256xi1>, vector<24x256xf32>
    %cst_36 = arith.constant dense<0.000000e+00> : vector<8x256xf32>
    %44 = tpu.matmul %32, %43, %cst_36 {dimension_numbers = #tpu.dot_dimension_numbers<[1], [0], [0], [1], [0, 0, 1, 1], [], []>} : vector<8x24xf32>, vector<24x256xf32>, vector<8x256xf32> -> vector<8x256xf32>
    %45 = arith.addf %30, %44 : vector<8x256xf32>
    %c0_37 = arith.constant 0 : index
    %c0_38 = arith.constant 0 : index
    %46 = vector.load %arg3[%c0_37, %c0_38] : memref<8x1xf32, #tpu.memory_space<vmem>>, vector<8x1xf32>
    %47 = vector.broadcast %46 : vector<8x1xf32> to vector<8x256xf32>
    %48 = arith.addf %45, %47 : vector<8x256xf32>
    %cst_39 = arith.constant 0.000000e+00 : f32
    %49 = vector.broadcast %cst_39 : f32 to vector<8x256xf32>
    %50 = arith.maximumf %48, %49 : vector<8x256xf32>
    %51 = vector.shape_cast %50 : vector<8x256xf32> to vector<1x8x256xf32>
    %c0_40 = arith.constant 0 : index
    %c0_41 = arith.constant 0 : index
    %c0_42 = arith.constant 0 : index
    %52 = vector.load %arg5[%c0_40, %c0_41, %c0_42] : memref<1x8x256xf32, #tpu.memory_space<vmem>>, vector<1x8x256xf32>
    tpu.vector_store %arg5[%c0_40, %c0_41, %c0_42], %51 {strides = array<i32>} : memref<1x8x256xf32, #tpu.memory_space<vmem>>, vector<1x8x256xf32>,
    return
  }
  func.func @transform_0(%arg0: i32) -> (i32, i32, i32) {
    %c0_i32 = arith.constant 0 : i32
    %c0_i32_0 = arith.constant 0 : i32
    %c0_i32_1 = arith.constant 0 : i32
    return %arg0, %c0_i32, %c0_i32_0 : i32, i32, i32
  }
  func.func @transform_1(%arg0: i32) -> (i32, i32, i32) {
    %c0_i32 = arith.constant 0 : i32
    %c0_i32_0 = arith.constant 0 : i32
    %c0_i32_1 = arith.constant 0 : i32
    %c0_i32_2 = arith.constant 0 : i32
    return %c0_i32, %c0_i32_0, %c0_i32_1 : i32, i32, i32
  }
  func.func @transform_2(%arg0: i32) -> (i32, i32) {
    %c0_i32 = arith.constant 0 : i32
    %c0_i32_0 = arith.constant 0 : i32
    %c0_i32_1 = arith.constant 0 : i32
    return %c0_i32, %c0_i32_0 : i32, i32
  }
  func.func @transform_3(%arg0: i32) -> (i32, i32) {
    %c0_i32 = arith.constant 0 : i32
    %c0_i32_0 = arith.constant 0 : i32
    %c0_i32_1 = arith.constant 0 : i32
    return %c0_i32, %c0_i32_0 : i32, i32
  }
  func.func @transform_4(%arg0: i32) -> (i32, i32, i32) {
    %c0_i32 = arith.constant 0 : i32
    %c0_i32_0 = arith.constant 0 : i32
    %c0_i32_1 = arith.constant 0 : i32
    return %arg0, %c0_i32, %c0_i32_0 : i32, i32, i32
  }
}

</mosaic_0001>

<bundles_post_ra>
// kernel: tpu_custom_call.1
= control target key start
LH: loop header
LB: loop body
LE: loop exit
PB: predicated region body
PF: predicated region fallthrough
CT: control target
= control target key end

     0   :  { %9 = vsyncpa [#allocation3], 0  ;;  %s1274_s0 = inlined_call_operand.hbm [shape: f32[2,8,290], index: 0, kind: input, shape index: {}]   ;;  %s1275_s1 = inlined_call_operand.hbm [shape: f32[3,8,24], index: 1, kind: input, shape index: {}]   ;;  %s1276_s2 = inlined_call_operand.vmem [shape: f32[8,1], index: 2, kind: input, shape index: {}]   ;;  %s1277_s3 = inlined_call_operand.vmem [shape: f32[2,256], index: 3, kind: input, shape index: {}]   ;;  %s1278_s4 = inlined_call_operand.hbm [shape: f32[2,8,256], index: 4, kind: output, shape index: {}]  }
   0x1   :  { %11 = vsyncpa [#allocation3 + $0x1], 0 }
   0x2   :  { %12 = vsyncpa [#allocation6], 0 }
   0x3   :  { %13 = vsyncpa [#allocation4], 0 }
   0x4   :  { %15 = vsyncpa [#allocation4 + $0x1], 0  ;;  %s1016_s15 = smov 0   ;;  %s1018_s16 = smov 0  }
   0x5   :  { %s1020_s17 = smov 0   ;;  %s1022_s18 = smov 0  }
   0x6 LB: > { %s1037_s19 = sadd.s32 4294967295, %s978_s18   ;;  %s695_s20 = sadd.s32 4294967294, %s978_s18   ;;  %s978_s18 = sphi %s1022_s18, %s1298_s18   ;;  %s974_s17 = sphi %s1020_s17, %s1297_s17   ;;  %s970_s16 = sphi %s1018_s16, %s1296_s16   ;;  %s966_s15 = sphi %s1016_s15, %s1295_s15  }
   0x7   : > { %p41_p0 = scmp.ne.s32.totalorder %s970_s16, %s966_s15  ;;  %p1279_p1 = scmp.eq.s32.totalorder %s1037_s19, 0 }
   0x8   : > { %p134_p3 = scmp.eq.s32.totalorder %s695_s20, 1  ;;  %p696_p5 = scmp.ge.s32.totalorder %s978_s18, 1 }
   0x9   : > { %p1046_p4 = por %p1279_p1, %p41_p0  ;;  %p141_p7 = scmp.lt.s32.totalorder %s978_s18, 3 }
   0xa   : > { %p1051_p6 = por %p134_p3, %p41_p0  ;;  %s980_s24 = smov [#allocation5]  }
   0xb   : > { %s1282_s21 = scalar_select %p1046_p4, 1, 0 }
   0xc   : > { %s1283_s22 = scalar_select %p1051_p6, 1, 0 }
   0xd   : > { %p1056_p8 = pnand %p696_p5, %p141_p7  ;;  %s153_s25 = sshll.u32 %s980_s24, 4  ;;  %s1060_s25 = int_to_ptr.vmem [resolvable:$true] %s153_s25 }
   0xe   : > { %s1072_s27 = sadd.s32 1, %s978_s18   ;;  %s28_s28 = sadd.s32 1, %s974_s17 }
   0xf   : > { %s1284_s23 = scalar_select %p1056_p8, 1, 0 }
  0x10   : > { %p756_p9 = pneg %p1056_p8  ;;  %s25_s29 = ssub.s32 %s978_s18, %s1072_s27 }
  0x11   : > { %s850_s6 = scalar_lea.hbm %s1275_s1, 384 }
  0x12   : > { %p1067_p11 = pnand %p756_p9, %p1279_p1  ;;  %p851_p12 = scmp.ne.s32.totalorder %s1275_s1, %s850_s6 }
  0x13   : > { %p857_p5 = scmp.lt.u32.totalorder %s850_s6, %s1275_s1 }
  0x14   : > { %p852_p13 = pneg %p1067_p11 }
  0x16   : > { %p853_p0 = pnand %p852_p13, %p851_p12 }
  0x18   : > { %p854_p3 = pneg %p853_p0 }
  0x1a   : > { %p859_p7 = pnand %p857_p5, %p854_p3 }
  0x1c   : > { %862 = shalt.err (!%p859_p7)
}
  0x1d   : > { %s863_s11 = scalar_lea.vmem %s1060_s25, 384  ;;  %p871_p2 = scmp.lt.s32.totalorder %s1060_s25, %s1060_s25 }
  0x1e   : > { %p864_p9 = scmp.ne.s32.totalorder %s1060_s25, %s863_s11  ;;  %p872_p6 = scmp.lt.s32.totalorder %s863_s11, %s863_s11 }
  0x20   : > { %p866_p10 = pnand %p864_p9, %p852_p13  ;;  %p873_p4 = por %p872_p6, %p871_p2 }
  0x22   : > { %p867_p1 = pneg %p866_p10 }
  0x24   : > { %p874_p8 = pnand %p873_p4, %p867_p1 }
  0x26   : > { %877 = shalt.err (!%p874_p8)
}
  0x27   : > { %s981_s12 = smov 128   ;;  %s982_s13 = smov 8  }
  0x28   : > { %759 = dma.hbm_to_vmem [thread:$0]  (!%p1067_p11), %s1275_s1, 384, %s1060_s25, [#allocation6], %s981_s12, %s981_s12, %s982_s13  }
  0x29   : > { %p26_p2 = scmp.eq.s32.totalorder %s25_s29, 0  ;;  %p35_p1 = scmp.ne.s32.totalorder %s974_s17, %s970_s16 }
  0x2a   : > { %p36_p4 = scmp.eq.s32.totalorder %s978_s18, 0  ;;  %p769_p6 = scmp.lt.s32.totalorder %s978_s18, 2 }
  0x2b   : > { %s1103_s24 = scalar_select %p26_p2, %s974_s17, %s28_s28  }
  0x2c   : > { %p37_p8 = por %p36_p4, %p35_p1  ;;  %p1286_p10 = scmp.eq.s32.totalorder %s1037_s19, 1 }
  0x2d   : > { %s173_s5 = sand.u32 1, %s974_s17   ;;  %s746_s6 = smul.u32 384, %s978_s18 }
  0x2e   : > { %p1107_p12 = por %p1286_p10, %p35_p1  ;;  %s745_s7 = smul.u32 24, %s173_s5 }
  0x2f   : > { %p1113_p13 = pnand %p769_p6, %p37_p8  ;;  %s1120_s28 = scalar_lea.hbm %s1274_s0, %s746_s6 }
  0x30   : > { %s177_s8 = scalar_lea.vmem [#allocation2], %s745_s7  ;;  %s174_s10 = scalar_lea.sflag [#allocation3], %s173_s5 }
  0x31   : > { %s185_s9 = sshll.u32 %s177_s8, 4  ;;  %s878_s11 = scalar_lea.hbm %s1120_s28, 384  ;;  %s1122_s9 = int_to_ptr.vmem [resolvable:$true] %s185_s9 }
  0x32   : > { %p879_p11 = scmp.ne.s32.totalorder %s1120_s28, %s878_s11  ;;  %p880_p0 = pneg %p1113_p13 }
  0x33   : > { %s883_s14 = scalar_lea.hbm %s1274_s0, 768  ;;  %p884_p7 = scmp.lt.u32.totalorder %s1120_s28, %s1274_s0 }
  0x34   : > { %p881_p3 = pnand %p880_p0, %p879_p11  ;;  %p885_p9 = scmp.lt.u32.totalorder %s883_s14, %s878_s11 }
  0x35   : > { %p887_p1 = scmp.lt.u32.totalorder %s878_s11, %s1120_s28 }
  0x36   : > { %p882_p5 = pneg %p881_p3  ;;  %p886_p2 = por %p885_p9, %p884_p7 }
  0x38   : > { %p888_p4 = por %p887_p1, %p886_p2 }
  0x3a   : > { %p889_p6 = pnand %p888_p4, %p882_p5 }
  0x3c   : > { %892 = shalt.err (!%p889_p6)
}
  0x3d   : > { %s893_s5 = scalar_lea.vmem %s1122_s9, 384  ;;  %s983_s7 = smov [#allocation2]  }
  0x3e   : > { %p894_p8 = scmp.ne.s32.totalorder %s1122_s9, %s893_s5  ;;  %s898_s25 = sshll.u32 %s983_s7, 4  ;;  %s899_s25 = int_to_ptr.vmem [resolvable:$false] %s898_s25 }
  0x3f   : > { %s900_s29 = scalar_lea.vmem %s899_s25, 768  ;;  %p901_p3 = scmp.lt.s32.totalorder %s1122_s9, %s899_s25 }
  0x40   : > { %p896_p10 = pnand %p894_p8, %p880_p0  ;;  %p902_p7 = scmp.lt.s32.totalorder %s900_s29, %s893_s5 }
  0x42   : > { %p897_p11 = pneg %p896_p10  ;;  %p903_p9 = por %p902_p7, %p901_p3 }
  0x44   : > { %p904_p2 = pnand %p903_p9, %p897_p11 }
  0x46   : > { %907 = shalt.err (!%p904_p2)
}
  0x47   : > { %763 = dma.hbm_to_vmem [thread:$0]  (!%p1113_p13), %s1120_s28, 384, %s1122_s9, %s174_s10  }
  0x48   : > { %p1289_p5 = scmp.ne.s32.totalorder %s1284_s23, 0 }
  0x49   : > { %s1152_s8 = sand.u32 (!%p1289_p5), 1, %s970_s16   ;;  %p1290_p0 = scmp.ne.s32.totalorder (!%p1289_p5), %s1282_s21, 0 }
  0x4a   : > { %194 = sbr.rel (%p1289_p5) target bundleno = 579 (0x243), region = 36  ;;  %s197_s12 = scalar_lea.sflag (!%p1289_p5), [#allocation3], %s1152_s8 }
  0x4b   : > { %s747_s11 = smul.u32 (!%p1289_p5), 24, %s1152_s8 }
  0x4d   : > { %s200_s13 = scalar_lea.vmem (!%p1289_p5), [#allocation2], %s747_s11 }
  0x51   : > { %953 = dma.done.wait (%p1290_p0), %s197_s12, 384  }
  0x52   : > { %955 = vsyncadd (%p1290_p0), %s197_s12, 4294966912  ;;  %p1291_p1 = scmp.eq.s32.totalorder %s1037_s19, 0 }
  0x54   : > { %957 = dma.done.wait (%p1291_p1), [#allocation6], 384   ;;  %p1292_p13 = pmov %p1291_p1 }
  0x55   : > { %v984_v0 = vmov 0   ;;  %v237_v1 = vld [vmem:[%s200_s13 + $0x8] sm:$0xff]  ;;  %v238_v2 = vld [vmem:[%s200_s13 + $0x10] sm:$0xff]  ;;  %s985_s23 = smov 96   ;;  %s986_s26 = smov 112   ;;  %v236_v4 = vld [vmem:[%s200_s13] sm:$0xff]  ;;  %v266_v5 = vlaneseq }
  0x56   : > { %959 = vsyncadd (%p1292_p13), [#allocation6], 4294966912  ;;  %848 = vset.pattern.permute.xlu1 %v984_v0  ;;  %849 = vset.pattern.permute.xlu0 %v984_v0  ;;  %v813_v3 = vpack.i.bf16 %v238_v2, %v237_v1  ;;  %s987_s21 = smov 127   ;;  %v229_v6 = vld [vmem:[%s1277_s3] ss:$2 sm:$0x3] }
  0x57   : > { %253 = vrot.lane.b32.xlu1 %v237_v1, %s985_s23  ;;  %v1170_v7 = vshrl.u32 %v266_v5, 7  ;;  %vm230_vm0 = vcmp.gt.f32.partialorder %v229_v6, 0.5  ;;  %vm248_vm1 = vcmask 916480   ;;  %vm257_vm5 = vcmask 785408   ;;  %s989_s10 = smov 126   ;;  %v260_v29 = vld [vmem:[#allocation5] sm:$0xff] }
  0x58   : > { %814 = vrot.lane.b32.xlu0 %v813_v3, %s986_s26  ;;  %v265_v9 = vsel %vm230_vm0, 1, %v984_v0  ;;  %v988_v25 = vmov 0.0   ;;  %vm282_vm7 = vcmask 195584   ;;  %v588_v30 = vld [vmem:[%s1276_s2] sm:$0xff]  ;;  %vm375_vm8 = vcmask 1039360   ;;  %v235_v56 = vld [vmem:[#allocation5 + $0x8] sm:$0xff] }
  0x59   : > { %v272_v8 = vsub.s32 1, %v1170_v7  ;;  %v268_v10 = vsub.s32 0, %v1170_v7  ;;  %455 = vmatprep.mubr.f32.mxu0 %v988_v25  ;;  %350 = vmatprep.mubr.f32.mxu1 %v988_v25  ;;  %v703_v35 = vld [vmem:[%s1277_s3 + $0x1] ss:$2 sm:$0x3]  ;;  %vm493_vm10 = vcmask 1031168  }
  0x5a   : > { %vm233_vm9 = vcmp.gt.f32.partialorder %v703_v35, 0.5  ;;  %s702_s7 = sshll.u32 %s1152_s8, 4  ;;  %s724_s25 = sshll.u32 %s1037_s19, 8 }
  0x5b   : > { %255 = vrot.lane.b32.xlu1 %v238_v2, %s985_s23  ;;  %v273_v11 = vrot.slane %v265_v9, %v272_v8  ;;  %v269_v13 = vrot.slane %v265_v9, %v268_v10  ;;  %v464_v48 = vsel %vm233_vm9, 1, %v984_v0  ;;  %s228_s29 = scalar_lea.vmem [#allocation7], %s702_s7  ;;  %s990_s19 = smov [#allocation7]  }
  0x5c   : > { %242 = vrot.lane.b32.xlu0 %v236_v4, %s986_s26  ;;  %v472_v53 = vrot.slane %v464_v48, %v272_v8  ;;  %v468_v54 = vrot.slane %v464_v48, %v268_v10  ;;  %s615_s11 = sshll.u32 %s228_s29, 4  ;;  %s601_s26 = scalar_lea.sflag [#allocation4], %s1152_s8  ;;  %s1232_s11 = int_to_ptr.vmem [resolvable:$true] %s615_s11 }
  0x5d   : > { %vm275_vm2 = vcmp.eq.s32.totalorder %v273_v11, 1  ;;  %vm274_vm3 = vcmp.eq.s32.totalorder %v269_v13, 1  ;;  %s912_s28 = sshll.u32 %s990_s19, 4  ;;  %s913_s28 = int_to_ptr.vmem [resolvable:$false] %s912_s28 }
  0x5e   : > { %vm726_vm4 = vmpackc.low %vm275_vm2, %vm275_vm2  ;;  %vm474_vm11 = vcmp.eq.s32.totalorder %v472_v53, 1  ;;  %vm473_vm12 = vcmp.eq.s32.totalorder %v468_v54, 1  ;;  %s914_s9 = scalar_lea.vmem %s913_s28, 512  ;;  %p915_p10 = scmp.lt.s32.totalorder %s1232_s11, %s913_s28 }
  0x5f   : > { %819 = vrot.lane.b32.xlu1 %v813_v3, %s987_s21  ;;  %vm729_vm6 = vmpackc.low %vm274_vm3, %vm274_vm3 }
  0x60   : > { %251 = vrot.lane.b32.xlu0 %v236_v4, %s985_s23  ;;  %vm736_vm13 = vmpackc.low %vm474_vm11, %vm474_vm11  ;;  %s1230_s23 = scalar_lea.hbm %s1278_s4, %s724_s25 }
  0x61   : > { %vm739_vm14 = vmpackc.low %vm473_vm12, %vm473_vm12 }
  0xc9   : > { %v254_v12 = vpop.permute.xlu1 %253 }
  0xca   : > { %v815_v14 = vpop.permute.xlu0 %814 }
  0xcb   : > { %v817_v15 = vunpack.i.h.bf16 %v815_v14  ;;  %v816_v16 = vunpack.i.l.bf16 %v815_v14 }
  0xcd   : > { %v256_v17 = vpop.permute.xlu1 %255  ;;  %v250_v18 = vsel %vm248_vm1, %v816_v16, %v817_v15 }
  0xce   : > { %373 = vrot.lane.b32.xlu1 %v256_v17, %s987_s21  ;;  %v243_v19 = vpop.permute.xlu0 %242  ;;  %v823_v20 = vpack.i.bf16 %v817_v15, %v250_v18  ;;  %v725_v21 = vpack.c.bf16 %v250_v18, %v237_v1  ;;  %v259_v27 = vsel %vm257_vm5, %v254_v12, %v256_v17 }
  0xcf   : > { %v249_v22 = vsel %vm248_vm1, %v243_v19, %v816_v16 }
  0xd0   : > { %824 = vrot.lane.b32.xlu0 %v823_v20, %s987_s21  ;;  %727 = vmatprep.subr.msk.bf16.mxu1 %vm726_vm4, %v725_v21  ;;  %v828_v23 = vpack.i.bf16 %v249_v22, %v236_v4  ;;  %v728_v24 = vpack.c.bf16 %v249_v22, %v236_v4 }
  0xd1   : > { %v820_v31 = vpop.permute.xlu1 %819 }
  0xd2   : > { %829 = vrot.lane.b32.xlu1 %v828_v23, %s987_s21  ;;  %v252_v26 = vpop.permute.xlu0 %251  ;;  %730 = vmatpush1.bf16.msk.msra.mxu1 %vm729_vm6, %v728_v24  ;;  %v822_v33 = vunpack.i.h.bf16 %v820_v31  ;;  %v821_v34 = vunpack.i.l.bf16 %v820_v31 }
  0xd3   : > { %708 = vmatprep.subr.msk.mxu1 %vm275_vm2, %v259_v27  ;;  %v258_v28 = vsel %vm257_vm5, %v252_v26, %v254_v12  ;;  %v463_v12 = vld [vmem:[#allocation5 + $0x10] sm:$0xff] }
  0xd4   : > { %371 = vrot.lane.b32.xlu0 %v259_v27, %s987_s21  ;;  %v377_v42 = vsel %vm375_vm8, %v821_v34, %v822_v33 }
  0xd6   : > { %834 = vrot.lane.b32.xlu1 %v813_v3, %s989_s10  ;;  %709 = vmatpush1.msk.msra.mxu1 %vm274_vm3, %v258_v28 }
  0xd7   : > { %710 = vmatmul.mubr.msk.f32.vlgmr.msra.gmra.mrb[0].mxu1 %vm282_vm7, %v260_v29 }
  0xd8   : > { %369 = vrot.lane.b32.xlu0 %v258_v28, %s987_s21  ;;  %s908_s21 = scalar_lea.vmem %s1232_s11, 256 }
  0xd9   : > { %p909_p4 = scmp.ne.s32.totalorder %s1232_s11, %s908_s21  ;;  %p916_p11 = scmp.lt.s32.totalorder %s914_s9, %s908_s21 }
  0xda   : > { %844 = vrot.lane.b32.xlu1 %v828_v23, %s989_s10 }
  0xdb   : > { %p910_p6 = pnand %p909_p4, %p1107_p12  ;;  %p917_p3 = por %p916_p11, %p915_p10 }
  0xdc   : > { %839 = vrot.lane.b32.xlu0 %v823_v20, %s989_s10 }
  0xdd   : > { %p911_p8 = pneg %p910_p6 }
  0xde   : > { %491 = vrot.lane.b32.xlu1 %v256_v17, %s989_s10 }
  0xdf   : > { %p918_p7 = pnand %p917_p3, %p911_p8 }
  0xe0   : > { %489 = vrot.lane.b32.xlu0 %v259_v27, %s989_s10 }
  0xe2   : > { %591 = vperm.xlu1 %848, %v588_v30  }
  0xe4   : > { %487 = vrot.lane.b32.xlu0 %v258_v28, %s989_s10 }
 0x140   : > { %v374_v32 = vpop.permute.xlu1 %373 }
 0x142   : > { %v825_v36 = vpop.permute.xlu0 %824 }
 0x143   : > { %v827_v37 = vunpack.i.h.bf16 %v825_v36  ;;  %v826_v38 = vunpack.i.l.bf16 %v825_v36 }
 0x144   : > { %v830_v39 = vpop.permute.xlu1 %829 }
 0x145   : > { %v832_v40 = vunpack.i.h.bf16 %v830_v39  ;;  %v831_v41 = vunpack.i.l.bf16 %v830_v39  ;;  %v379_v43 = vsel %vm375_vm8, %v826_v38, %v827_v37 }
 0x146   : > { %v372_v44 = vpop.permute.xlu0 %371  ;;  %v731_v45 = vpack.c.bf16 %v379_v43, %v377_v42 }
 0x147   : > { %v376_v46 = vsel %vm375_vm8, %v831_v41, %v821_v34  ;;  %v378_v47 = vsel %vm375_vm8, %v832_v40, %v826_v38  ;;  %v381_v52 = vsel %vm375_vm8, %v372_v44, %v374_v32 }
 0x148   : > { %v835_v49 = vpop.permute.xlu1 %834  ;;  %732 = vmatprep.subr.bf16.mxu0 %v731_v45  ;;  %v733_v50 = vpack.c.bf16 %v378_v47, %v376_v46 }
 0x149   : > { %v837_v57 = vunpack.i.h.bf16 %v835_v49  ;;  %v836_v58 = vunpack.i.l.bf16 %v835_v49 }
 0x14a   : > { %v370_v51 = vpop.permute.xlu0 %369  ;;  %734 = vmatpush1.bf16.msra.mxu0 %v733_v50 }
 0x14b   : > { %395 = vmatprep.subr.mxu0 %v381_v52  ;;  %v380_v60 = vsel %vm375_vm8, %v370_v51, %v372_v44  ;;  %v495_v1 = vsel %vm493_vm10, %v836_v58, %v837_v57 }
 0x14c   : > { %v845_v55 = vpop.permute.xlu1 %844 }
 0x14d   : > { %v846_v59 = vunpack.i.l.bf16 %v845_v55  ;;  %v847_v62 = vunpack.i.h.bf16 %v845_v55 }
 0x14e   : > { %v840_v61 = vpop.permute.xlu0 %839  ;;  %396 = vmatpush1.msra.mxu0 %v380_v60 }
 0x14f   : > { %v842_v63 = vunpack.i.h.bf16 %v840_v61  ;;  %v841_v0 = vunpack.i.l.bf16 %v840_v61  ;;  %711 = vmatmul.mubr.msk.f32.vlgmr.msra.gmra.mrb[0].mxu0 %vm282_vm7, %v235_v56  ;;  %v494_v2 = vsel %vm493_vm10, %v846_v59, %v836_v58 }
 0x150   : > { %579 = vmatprep.mubr.f32.mxu0 %v988_v25  ;;  %v492_v8 = vpop.permute.xlu1 %491 }
 0x151   : > { %v496_v3 = vsel %vm493_vm10, %v847_v62, %v841_v0  ;;  %v497_v4 = vsel %vm493_vm10, %v841_v0, %v842_v63 }
 0x152   : > { %v735_v5 = vpack.c.bf16 %v497_v4, %v495_v1  ;;  %v738_v6 = vpack.c.bf16 %v496_v3, %v494_v2  ;;  %v490_v7 = vpop.permute.xlu0 %489 }
 0x153   : > { %v499_v9 = vsel %vm493_vm10, %v490_v7, %v492_v8 }
 0x154   : > { %737 = vmatprep.subr.msk.bf16.mxu0 %vm736_vm13, %v735_v5 }
 0x155   : > { %740 = vmatpush1.bf16.msk.msra.mxu0 %vm739_vm14, %v738_v6 }
 0x156   : > { %v488_v10 = vpop.permute.xlu0 %487  ;;  %716 = vmatprep.subr.msk.mxu0 %vm474_vm11, %v499_v9 }
 0x157   : > { %v498_v11 = vsel %vm493_vm10, %v488_v10, %v490_v7 }
 0x159   : > { %717 = vmatpush1.msk.msra.mxu0 %vm473_vm12, %v498_v11 }
 0x15a   : > { %718 = vmatmul.mubr.msk.f32.vlgmr.msra.gmra.mrb[0].mxu0 %vm282_vm7, %v463_v12 }
 0x161   : > { %v592_v16 = vpop.permute.xlu1 %591 }
 0x1aa   : > { %v352_v13 = vpop.f32.mrb[0].mxu1 }
 0x1ab   : > { %v354_v14 = vpop.f32.mrb[1].mxu1 }
 0x22d   : > { %v581_v15 = vpop.f32.mrb[0].mxu0 }
 0x22e   : > { %v741_v17 = vadd.f32 %v581_v15, %v352_v13  ;;  %v583_v18 = vpop.f32.mrb[1].mxu0 }
 0x22f   : > { %v742_v19 = vadd.f32 %v583_v18, %v354_v14 }
 0x230   : > { %v594_v20 = vadd.f32 %v741_v17, %v592_v16 }
 0x231   : > { %v595_v21 = vadd.f32 %v742_v19, %v592_v16 }
 0x232   : > { %v596_v22 = vmax.f32 %v594_v20, 0.0 }
 0x233   : > { %v597_v23 = vmax.f32 %v595_v21, 0.0 }
 0x234   : > { %598 = vst [vmem:[%s228_s29] sm:$0xff] %v596_v22 }
 0x235   : > { %599 = vst [vmem:[%s228_s29 + $0x8] sm:$0xff] %v597_v23 }
 0x236   : > { %921 = shalt.err (!%p918_p7)
}
 0x237   : > { %s922_s8 = scalar_lea.hbm %s1230_s23, 256  ;;  %s926_s20 = scalar_lea.hbm %s1278_s4, 512 }
 0x238   : > { %p923_p9 = scmp.ne.s32.totalorder %s1230_s23, %s922_s8  ;;  %p927_p0 = scmp.lt.u32.totalorder %s1230_s23, %s1278_s4 }
 0x239   : > { %p928_p1 = scmp.lt.u32.totalorder %s926_s20, %s922_s8  ;;  %p930_p4 = scmp.lt.u32.totalorder %s922_s8, %s1230_s23 }
 0x23a   : > { %p924_p2 = pnand %p923_p9, %p1107_p12 }
 0x23b   : > { %p929_p13 = por %p928_p1, %p927_p0 }
 0x23c   : > { %p925_p5 = pneg %p924_p2 }
 0x23d   : > { %p931_p6 = por %p930_p4, %p929_p13 }
 0x23f   : > { %p932_p8 = pnand %p931_p6, %p925_p5 }
 0x241   : > { %935 = shalt.err (!%p932_p8)
}
 0x242   : > { %754 = dma.vmem_to_hbm [thread:$0]  (%p1107_p12), %s1232_s11, 256, %s1230_s23, %s601_s26  }
 0x243 PF: > { %s627_s7 = sand.u32 1, %s966_s15   ;;  %p1293_p10 = scmp.ne.s32.totalorder %s1283_s22, 0 }
 0x244   : > { %p1294_p11 = scmp.ge.s32.totalorder %s978_s18, 2  ;;  %s628_s25 = scalar_lea.sflag [#allocation4], %s627_s7 }
 0x246   : > { %p765_p3 = pnand %p1294_p11, %p1293_p10 }
 0x248   : > { %961 = dma.done.wait (!%p765_p3), %s628_s25, 256  }
 0x249   : > { %963 = vsyncadd (!%p765_p3), %s628_s25, 4294967040  ;;  %p18_p7 = scmp.ge.s32.totalorder %s1072_s27, 4   ;;  %s1295_s15 = smov %s970_s16 }
 0x24a   : > { %s1296_s16 = smov %s974_s17  ;;  %s1297_s17 = smov %s1103_s24 }
 0x24b   : > { %s1298_s18 = smov %s1072_s27  ;;  %20 = sbr.rel (!%p18_p7) target bundleno = 6 (0x6), region = 88 }
 0x252   :  { %633 = vsyncpa [#allocation3], 1 }
 0x253   :  { %635 = vsyncpa [#allocation3 + $0x1], 1 }
 0x254   :  { %636 = vsyncpa [#allocation6], 1 }
 0x255   :  { %637 = vsyncpa [#allocation4], 1 }
 0x256   :  { %639 = vsyncpa [#allocation4 + $0x1], 1 }

</bundles_post_ra>
